<compile_context>
chip_gen: v7x
topology: tpu7x:2x2x1
jax: 0.10.0
libtpu: 0.0.40
codegen_flags: <defaults>
</compile_context>

<pallas_src>
import functools

import jax
import jax.numpy as jnp
from jax.experimental import pallas as pl
from jax.experimental.pallas import tpu as pltpu


# ---------------------------------------------------------------------------
# Feature dims (mirrors get_atom_feature_dims in the PyTorch module)
# ---------------------------------------------------------------------------
X_MAP_DEFAULT = {
    "atomic_num": list(range(0, 119)),
    "chirality": ["CHI_UNSPECIFIED", "CHI_TETRAHEDRAL_CW",
                  "CHI_TETRAHEDRAL_CCW", "CHI_OTHER"],
    "degree": list(range(0, 11)),
    "formal_charge": list(range(-5, 7)),
    "num_hs": list(range(0, 9)),
    "num_radical_electrons": list(range(0, 5)),
    "hybridization": ["UNSPECIFIED", "S", "SP", "SP2", "SP3", "SP3D",
                      "SP3D2", "OTHER"],
    "is_aromatic": [False, True],
    "is_in_ring": [False, True],
}


def get_atom_feature_dims():
    keys = ["atomic_num", "chirality", "degree", "formal_charge", "num_hs",
            "num_radical_electrons", "hybridization", "is_aromatic",
            "is_in_ring"]
    return [len(X_MAP_DEFAULT[k]) for k in keys]


def _round_up(x, m):
    return (x + m - 1) // m * m


# ---------------------------------------------------------------------------
# Pallas kernel
# ---------------------------------------------------------------------------
def atom_encoder_kernel(idx_ref, tab_ref, out_ref, *, offsets):
    # idx_ref: (tn, F)     int32 local (per-feature) categorical indices
    # tab_ref: (V, E_pad)  f32/bf16 concatenated, zero-padded embedding table
    # out_ref: (tn, E_pad) f32
    # offsets: static python tuple of per-feature row offsets (baked in).
    idx = idx_ref[...]                                          # (tn, F)
    tn = out_ref.shape[0]
    v = tab_ref.shape[0]

    # Lane iota over the concatenated vocab; hoisted out of the feature loop.
    iota = jax.lax.broadcasted_iota(jnp.int32, (tn, v), 1)      # (tn, V)

    # Unrolled 2-D multi-hot accumulation: pure VPU compare + add, no padded
    # (tn, F, V) intermediate, no cross-sublane reduction, no SMEM reads
    # (offsets are compile-time immediates).
    multihot = jnp.zeros((tn, v), jnp.float32)
    for f, off in enumerate(offsets):
        gidx = idx[:, f:f + 1] + off                            # (tn, 1)
        multihot = multihot + (gidx == iota).astype(jnp.float32)

    tab = tab_ref[...]
    if tab.dtype == jnp.bfloat16:
        # multihot is exact 0/1 -> lossless in bf16; native MXU path.
        out_ref[...] = jnp.dot(multihot.astype(jnp.bfloat16), tab,
                               preferred_element_type=jnp.float32)
    else:
        # Exact-parity path: keep f32 through the MXU.
        out_ref[...] = jnp.dot(multihot, tab,
                               preferred_element_type=jnp.float32,
                               precision=jax.lax.Precision.HIGHEST)


def atom_encoder_forward(x_idx, table, offsets, emb_dim, *, tile_n=512):
    """x_idx: [N, F] int32 local per-feature indices;
       table: [V_pad, E_pad] concatenated (zero-padded) embedding table;
       offsets: tuple/list of static per-feature row offsets into the table.
       Returns [N, emb_dim] float32."""
    n, f = x_idx.shape
    v, e_pad = table.shape
    offsets = tuple(int(o) for o in offsets)
    assert len(offsets) == f

    # Effective tile: multiple of 8, no bigger than needed for small N.
    tn = min(_round_up(tile_n, 8), max(8, _round_up(n, 8)))
    n_pad = _round_up(n, tn)
    if n_pad != n:
        # Padded rows use index 0 (valid); their rows are sliced off below.
        x_idx = jnp.pad(x_idx, ((0, n_pad - n), (0, 0)))

    grid = (n_pad // tn,)
    kernel = functools.partial(atom_encoder_kernel, offsets=offsets)

    out = pl.pallas_call(
        kernel,
        out_shape=jax.ShapeDtypeStruct((n_pad, e_pad), jnp.float32),
        grid_spec=pltpu.PrefetchScalarGridSpec(
            num_scalar_prefetch=0,
            grid=grid,
            in_specs=[
                pl.BlockSpec((tn, f), lambda i: (i, 0)),
                # Constant index_map: the 256x128 table is DMA'd once and
                # stays resident across all grid steps.
                pl.BlockSpec((v, e_pad), lambda i: (0, 0)),
            ],
            out_specs=pl.BlockSpec((tn, e_pad), lambda i: (i, 0)),
        ),
        compiler_params=pltpu.CompilerParams(
            dimension_semantics=("parallel",)),
    )(x_idx, table)

    # Strip node padding and the lane-padding of the embedding dim.
    return out[:n, :emb_dim]


# ---------------------------------------------------------------------------
# Parameter setup (deterministic Xavier-uniform init, same shapes as PyTorch)
# ---------------------------------------------------------------------------
def init_tables(emb_dim, key):
    dims = get_atom_feature_dims()
    tables = []
    for dim in dims:
        key, sub = jax.random.split(key)
        bound = (6.0 / (dim + emb_dim)) ** 0.5            # xavier_uniform_
        tables.append(jax.random.uniform(
            sub, (dim, emb_dim), jnp.float32, minval=-bound, maxval=bound))
    return tables


def build_concat_table(tables, *, pad_vocab=256, lane=128, dtype=jnp.float32):
    dims = [t.shape[0] for t in tables]
    total = sum(dims)
    emb_dim = tables[0].shape[1]
    if total > pad_vocab:
        raise ValueError(
            f"sum of feature dims ({total}) exceeds pad_vocab ({pad_vocab})")
    e_pad = max(lane, _round_up(emb_dim, lane))           # lane-dense output
    concat = jnp.concatenate(tables, axis=0)              # (total, E)
    padded = jnp.zeros((pad_vocab, e_pad), jnp.float32)
    padded = padded.at[:total, :emb_dim].set(concat)
    offsets = tuple(sum(dims[:i]) for i in range(len(dims)))  # static ints
    return padded.astype(dtype), offsets


# ---------------------------------------------------------------------------
# Main
# ---------------------------------------------------------------------------
if __name__ == "__main__":
    emb_dim = 32
    num_nodes = 16
    dims = get_atom_feature_dims()
    num_feats = len(dims)

    key = jax.random.PRNGKey(0)
    key, k_tab, k_idx = jax.random.split(key, 3)

    tables = init_tables(emb_dim, k_tab)
    # f32 table for exact parity; pass dtype=jnp.bfloat16 for the fast
    # v6e/v7x MXU path (looser tolerance).
    table_concat, offsets = build_concat_table(tables, pad_vocab=256,
                                               dtype=jnp.float32)

    # Random but valid categorical indices per feature.
    idx_cols = []
    for d in dims:
        k_idx, sub = jax.random.split(k_idx)
        idx_cols.append(jax.random.randint(sub, (num_nodes, 1), 0, d,
                                           jnp.int32))
    x = jnp.concatenate(idx_cols, axis=1)                 # (N, F) int32

    out = atom_encoder_forward(x, table_concat, offsets, emb_dim, tile_n=512)
    out = jax.block_until_ready(out)

    # Pure-JAX reference: sum_i tables[i][x[:, i]]
    ref = jnp.zeros((num_nodes, emb_dim), jnp.float32)
    for i in range(num_feats):
        ref = ref + tables[i][x[:, i]]

    assert out.shape == (num_nodes, emb_dim)
    assert jnp.allclose(out, ref, atol=1e-5, rtol=1e-5)

    print("KERNEL_OK")
</pallas_src>

<mosaic_0001>
module attributes {stable_mosaic.version = 11 : i64} {
  func.func @atom_encoder_kernel(%arg0: i32, %arg1: memref<16x9xi32, #tpu.memory_space<vmem>>, %arg2: memref<256x128xf32, #tpu.memory_space<vmem>>, %arg3: memref<16x128xf32, #tpu.memory_space<vmem>>) attributes {dimension_semantics = [#tpu.dimension_semantics<parallel>], iteration_bounds = array<i64: 1>, scalar_prefetch = 0 : i64, scratch_operands = 0 : i64, tpu.core_type = #tpu.core_type<tc>, window_params = [{transform_indices = @transform_0, window_bounds = array<i64: 16, 9>}, {pipeline_mode = #tpu.pipeline_mode<synchronous>, transform_indices = @transform_1, window_bounds = array<i64: 256, 128>}, {transform_indices = @transform_2, window_bounds = array<i64: 16, 128>}]} {
    %c0 = arith.constant 0 : index
    %c0_0 = arith.constant 0 : index
    %0 = vector.load %arg1[%c0, %c0_0] : memref<16x9xi32, #tpu.memory_space<vmem>>, vector<16x9xi32>
    %1 = tpu.iota {dimensions = array<i32: 1>} : vector<16x256xi32>
    %cst = arith.constant 0.000000e+00 : f32
    %2 = vector.broadcast %cst : f32 to vector<16x256xf32>
    %3 = vector.extract_strided_slice %0 {offsets = [0, 0], sizes = [16, 1], strides = [1, 1]} : vector<16x9xi32> to vector<16x1xi32>
    %c0_i32 = arith.constant 0 : i32
    %4 = vector.broadcast %c0_i32 : i32 to vector<16x1xi32>
    %5 = arith.addi %3, %4 : vector<16x1xi32>
    %6 = vector.broadcast %5 : vector<16x1xi32> to vector<16x256xi32>
    %7 = arith.cmpi eq, %6, %1 : vector<16x256xi32>
    %8 = arith.extui %7 : vector<16x256xi1> to vector<16x256xi32>
    %9 = arith.sitofp %8 : vector<16x256xi32> to vector<16x256xf32>
    %10 = arith.addf %2, %9 : vector<16x256xf32>
    %11 = vector.extract_strided_slice %0 {offsets = [0, 1], sizes = [16, 1], strides = [1, 1]} : vector<16x9xi32> to vector<16x1xi32>
    %c119_i32 = arith.constant 119 : i32
    %12 = vector.broadcast %c119_i32 : i32 to vector<16x1xi32>
    %13 = arith.addi %11, %12 : vector<16x1xi32>
    %14 = vector.broadcast %13 : vector<16x1xi32> to vector<16x256xi32>
    %15 = arith.cmpi eq, %14, %1 : vector<16x256xi32>
    %16 = arith.extui %15 : vector<16x256xi1> to vector<16x256xi32>
    %17 = arith.sitofp %16 : vector<16x256xi32> to vector<16x256xf32>
    %18 = arith.addf %10, %17 : vector<16x256xf32>
    %19 = vector.extract_strided_slice %0 {offsets = [0, 2], sizes = [16, 1], strides = [1, 1]} : vector<16x9xi32> to vector<16x1xi32>
    %c123_i32 = arith.constant 123 : i32
    %20 = vector.broadcast %c123_i32 : i32 to vector<16x1xi32>
    %21 = arith.addi %19, %20 : vector<16x1xi32>
    %22 = vector.broadcast %21 : vector<16x1xi32> to vector<16x256xi32>
    %23 = arith.cmpi eq, %22, %1 : vector<16x256xi32>
    %24 = arith.extui %23 : vector<16x256xi1> to vector<16x256xi32>
    %25 = arith.sitofp %24 : vector<16x256xi32> to vector<16x256xf32>
    %26 = arith.addf %18, %25 : vector<16x256xf32>
    %27 = vector.extract_strided_slice %0 {offsets = [0, 3], sizes = [16, 1], strides = [1, 1]} : vector<16x9xi32> to vector<16x1xi32>
    %c134_i32 = arith.constant 134 : i32
    %28 = vector.broadcast %c134_i32 : i32 to vector<16x1xi32>
    %29 = arith.addi %27, %28 : vector<16x1xi32>
    %30 = vector.broadcast %29 : vector<16x1xi32> to vector<16x256xi32>
    %31 = arith.cmpi eq, %30, %1 : vector<16x256xi32>
    %32 = arith.extui %31 : vector<16x256xi1> to vector<16x256xi32>
    %33 = arith.sitofp %32 : vector<16x256xi32> to vector<16x256xf32>
    %34 = arith.addf %26, %33 : vector<16x256xf32>
    %35 = vector.extract_strided_slice %0 {offsets = [0, 4], sizes = [16, 1], strides = [1, 1]} : vector<16x9xi32> to vector<16x1xi32>
    %c146_i32 = arith.constant 146 : i32
    %36 = vector.broadcast %c146_i32 : i32 to vector<16x1xi32>
    %37 = arith.addi %35, %36 : vector<16x1xi32>
    %38 = vector.broadcast %37 : vector<16x1xi32> to vector<16x256xi32>
    %39 = arith.cmpi eq, %38, %1 : vector<16x256xi32>
    %40 = arith.extui %39 : vector<16x256xi1> to vector<16x256xi32>
    %41 = arith.sitofp %40 : vector<16x256xi32> to vector<16x256xf32>
    %42 = arith.addf %34, %41 : vector<16x256xf32>
    %43 = vector.extract_strided_slice %0 {offsets = [0, 5], sizes = [16, 1], strides = [1, 1]} : vector<16x9xi32> to vector<16x1xi32>
    %c155_i32 = arith.constant 155 : i32
    %44 = vector.broadcast %c155_i32 : i32 to vector<16x1xi32>
    %45 = arith.addi %43, %44 : vector<16x1xi32>
    %46 = vector.broadcast %45 : vector<16x1xi32> to vector<16x256xi32>
    %47 = arith.cmpi eq, %46, %1 : vector<16x256xi32>
    %48 = arith.extui %47 : vector<16x256xi1> to vector<16x256xi32>
    %49 = arith.sitofp %48 : vector<16x256xi32> to vector<16x256xf32>
    %50 = arith.addf %42, %49 : vector<16x256xf32>
    %51 = vector.extract_strided_slice %0 {offsets = [0, 6], sizes = [16, 1], strides = [1, 1]} : vector<16x9xi32> to vector<16x1xi32>
    %c160_i32 = arith.constant 160 : i32
    %52 = vector.broadcast %c160_i32 : i32 to vector<16x1xi32>
    %53 = arith.addi %51, %52 : vector<16x1xi32>
    %54 = vector.broadcast %53 : vector<16x1xi32> to vector<16x256xi32>
    %55 = arith.cmpi eq, %54, %1 : vector<16x256xi32>
    %56 = arith.extui %55 : vector<16x256xi1> to vector<16x256xi32>
    %57 = arith.sitofp %56 : vector<16x256xi32> to vector<16x256xf32>
    %58 = arith.addf %50, %57 : vector<16x256xf32>
    %59 = vector.extract_strided_slice %0 {offsets = [0, 7], sizes = [16, 1], strides = [1, 1]} : vector<16x9xi32> to vector<16x1xi32>
    %c168_i32 = arith.constant 168 : i32
    %60 = vector.broadcast %c168_i32 : i32 to vector<16x1xi32>
    %61 = arith.addi %59, %60 : vector<16x1xi32>
    %62 = vector.broadcast %61 : vector<16x1xi32> to vector<16x256xi32>
    %63 = arith.cmpi eq, %62, %1 : vector<16x256xi32>
    %64 = arith.extui %63 : vector<16x256xi1> to vector<16x256xi32>
    %65 = arith.sitofp %64 : vector<16x256xi32> to vector<16x256xf32>
    %66 = arith.addf %58, %65 : vector<16x256xf32>
    %67 = vector.extract_strided_slice %0 {offsets = [0, 8], sizes = [16, 1], strides = [1, 1]} : vector<16x9xi32> to vector<16x1xi32>
    %c170_i32 = arith.constant 170 : i32
    %68 = vector.broadcast %c170_i32 : i32 to vector<16x1xi32>
    %69 = arith.addi %67, %68 : vector<16x1xi32>
    %70 = vector.broadcast %69 : vector<16x1xi32> to vector<16x256xi32>
    %71 = arith.cmpi eq, %70, %1 : vector<16x256xi32>
    %72 = arith.extui %71 : vector<16x256xi1> to vector<16x256xi32>
    %73 = arith.sitofp %72 : vector<16x256xi32> to vector<16x256xf32>
    %74 = arith.addf %66, %73 : vector<16x256xf32>
    %c0_1 = arith.constant 0 : index
    %c0_2 = arith.constant 0 : index
    %75 = vector.load %arg2[%c0_1, %c0_2] : memref<256x128xf32, #tpu.memory_space<vmem>>, vector<256x128xf32>
    %cst_3 = arith.constant dense<0.000000e+00> : vector<16x128xf32>
    %76 = tpu.matmul %74, %75, %cst_3 {dimension_numbers = #tpu.dot_dimension_numbers<[1], [0], [0], [1], [0, 0, 1, 1], [], []>, precision = #tpu.contract_precision<fp32>} : vector<16x256xf32>, vector<256x128xf32>, vector<16x128xf32> -> vector<16x128xf32>
    %c0_4 = arith.constant 0 : index
    %c0_5 = arith.constant 0 : index
    %77 = vector.load %arg3[%c0_4, %c0_5] : memref<16x128xf32, #tpu.memory_space<vmem>>, vector<16x128xf32>
    tpu.vector_store %arg3[%c0_4, %c0_5], %76 {strides = array<i32>} : memref<16x128xf32, #tpu.memory_space<vmem>>, vector<16x128xf32>,
    return
  }
  func.func @transform_0(%arg0: i32) -> (i32, i32) {
    %c0_i32 = arith.constant 0 : i32
    %c0_i32_0 = arith.constant 0 : i32
    return %arg0, %c0_i32 : i32, i32
  }
  func.func @transform_1(%arg0: i32) -> (i32, i32) {
    %c0_i32 = arith.constant 0 : i32
    %c0_i32_0 = arith.constant 0 : i32
    %c0_i32_1 = arith.constant 0 : i32
    return %c0_i32, %c0_i32_0 : i32, i32
  }
  func.func @transform_2(%arg0: i32) -> (i32, i32) {
    %c0_i32 = arith.constant 0 : i32
    %c0_i32_0 = arith.constant 0 : i32
    return %arg0, %c0_i32 : i32, i32
  }
}

</mosaic_0001>

<bundles_post_ra>
// kernel: tpu_custom_call.1
= control target key start
LH: loop header
LB: loop body
LE: loop exit
PB: predicated region body
PF: predicated region fallthrough
CT: control target
= control target key end

     0   :  { %7 = vsyncpa [#allocation3], 0  ;;  %s2683_s0 = inlined_call_operand.hbm [shape: s32[16,9], index: 0, kind: input, shape index: {}]   ;;  %s2684_s1 = inlined_call_operand.hbm [shape: f32[256,128], index: 1, kind: input, shape index: {}]   ;;  %s2685_s2 = inlined_call_operand.hbm [shape: f32[16,128], index: 2, kind: output, shape index: {}]  }
   0x1   :  { %8 = vsyncpa [#allocation6], 0 }
   0x2   :  { %9 = vsyncpa [#allocation4], 0  ;;  %s1790_s9 = smov [#allocation2]   ;;  %s1718_s13 = scalar_lea.hbm %s2683_s0, 256 }
   0x3   :  { %s15_s10 = sshll.u32 %s1790_s9, 4  ;;  %p1719_p0 = scmp.ne.s32.totalorder %s2683_s0, %s1718_s13  ;;  %s16_s10 = int_to_ptr.vmem [resolvable:$true] %s15_s10 }
   0x4   :  { %p1722_p1 = scmp.lt.u32.totalorder %s1718_s13, %s2683_s0 }
   0x6   :  { %p1724_p2 = pnand %p1722_p1, %p1719_p0 }
   0x8   :  { %1727 = shalt.err (!%p1724_p2)
}
   0x9   :  { %s1728_s18 = scalar_lea.vmem %s16_s10, 256  ;;  %p1733_p4 = scmp.lt.s32.totalorder %s16_s10, %s16_s10 }
   0xa   :  { %p1729_p3 = scmp.ne.s32.totalorder %s16_s10, %s1728_s18  ;;  %p1734_p5 = scmp.lt.s32.totalorder %s1728_s18, %s1728_s18 }
   0xc   :  { %p1735_p6 = por %p1734_p5, %p1733_p4 }
   0xe   :  { %p1736_p7 = pnand %p1735_p6, %p1729_p3 }
  0x10   :  { %1739 = shalt.err (!%p1736_p7)
}
  0x11   :  { %s1791_s19 = smov 128   ;;  %s1792_s20 = smov 8  }
  0x12   :  { %21 = dma.hbm_to_vmem [thread:$0]  %s2683_s0, 256, %s16_s10, [#allocation3], %s1791_s19, %s1791_s19, %s1792_s20  }
  0x13   :  { %s1793_s23 = smov [#allocation5]   ;;  %s1740_s27 = scalar_lea.hbm %s2684_s1, 4096 }
  0x14   :  { %s27_s24 = sshll.u32 %s1793_s23, 4  ;;  %p1741_p8 = scmp.ne.s32.totalorder %s2684_s1, %s1740_s27  ;;  %s28_s24 = int_to_ptr.vmem [resolvable:$true] %s27_s24 }
  0x15   :  { %p1744_p9 = scmp.lt.u32.totalorder %s1740_s27, %s2684_s1 }
  0x17   :  { %p1746_p10 = pnand %p1744_p9, %p1741_p8 }
  0x19   :  { %1749 = shalt.err (!%p1746_p10)
}
  0x1a   :  { %s1750_s4 = scalar_lea.vmem %s28_s24, 4096  ;;  %p1755_p12 = scmp.lt.s32.totalorder %s28_s24, %s28_s24 }
  0x1b   :  { %p1751_p11 = scmp.ne.s32.totalorder %s28_s24, %s1750_s4  ;;  %p1756_p13 = scmp.lt.s32.totalorder %s1750_s4, %s1750_s4 }
  0x1d   :  { %p1757_p0 = por %p1756_p13, %p1755_p12 }
  0x1f   :  { %p1758_p1 = pnand %p1757_p0, %p1751_p11 }
  0x21   :  { %1761 = shalt.err (!%p1758_p1)
}
  0x22   :  { %33 = dma.hbm_to_vmem [thread:$0]  %s2684_s1, 4096, %s28_s24, [#allocation6], %s1791_s19, %s1791_s19, %s1792_s20  }
  0x23   :  { %1784 = dma.done.wait [#allocation3], 256  }
  0x24   :  { %1785 = vsyncadd [#allocation3], 4294967040 }
  0x25   :  { %1786 = dma.done.wait [#allocation6], 4096  }
  0x26   :  { %1787 = vsyncadd [#allocation6], 4294963200  ;;  %v1794_v0 = vmov 0   ;;  %v1795_v1 = vmov 2   ;;  %v40_v2 = vld [vmem:[#allocation2] sm:$0xff]  ;;  %v1852_v3 = vld [vmem:[#allocation2 + $0x8] sm:$0xff] }
  0x27   :  { %1700 = vset.pattern.permute.xlu0 %v1794_v0  ;;  %1702 = vset.pattern.permute.xlu1 %v1795_v1  ;;  %v1854_v4 = vld [vmem:[#allocation5 + $0x80] sm:$0xff]  ;;  %v91_v5 = vadd.s32 123, %v40_v2  ;;  %v67_v6 = vadd.s32 119, %v40_v2  ;;  %v115_v7 = vadd.s32 134, %v40_v2  ;;  %v1856_v8 = vadd.s32 146, %v40_v2  ;;  %v1858_v9 = vld [vmem:[#allocation5 + $0x88] sm:$0xff] }
  0x28   :  { %46 = vperm.xlu0 %1700, %v40_v2   ;;  %v1860_v10 = vld [vmem:[#allocation5] sm:$0xff]  ;;  %v163_v11 = vadd.s32 155, %v40_v2  ;;  %v1862_v12 = vadd.s32 160, %v40_v2  ;;  %v1864_v13 = vadd.s32 168, %v40_v2  ;;  %v1866_v14 = vadd.s32 170, %v40_v2  ;;  %v1868_v15 = vld [vmem:[#allocation5 + $0x8] sm:$0xff] }
  0x29   :  { %v1870_v16 = vld [vmem:[#allocation5 + $0x90] sm:$0xff]  ;;  %94 = vperm.xlu1 %1702, %v91_v5   ;;  %v1873_v17 = vadd.s32 119, %v1852_v3  ;;  %v1876_v18 = vadd.s32 123, %v1852_v3  ;;  %v1879_v19 = vadd.s32 134, %v1852_v3  ;;  %v1882_v20 = vadd.s32 146, %v1852_v3  ;;  %v1884_v21 = vld [vmem:[#allocation5 + $0x98] sm:$0xff] }
  0x2a   :  { %v1886_v22 = vld [vmem:[#allocation5 + $0x10] sm:$0xff]  ;;  %v1889_v23 = vadd.s32 155, %v1852_v3  ;;  %v1892_v24 = vadd.s32 160, %v1852_v3  ;;  %v1895_v25 = vadd.s32 168, %v1852_v3  ;;  %v1898_v26 = vadd.s32 170, %v1852_v3  ;;  %v1900_v27 = vld [vmem:[#allocation5 + $0x18] sm:$0xff] }
  0x2b   :  { %v2704_v28 = vmov 1   ;;  %v340_v29 = vand.u32 4294901760, %v1854_v4  ;;  %v343_v30 = vand.u32 4294901760, %v1858_v9  ;;  %v292_v31 = vand.u32 4294901760, %v1860_v10  ;;  %v1982_v2 = vld [vmem:[#allocation5 + $0xa0] sm:$0xff]  ;;  %s1804_s1 = smov [#allocation7]  }
  0x2c   :  { %1701 = vset.pattern.permute.xlu0 %v2704_v28  ;;  %v295_v32 = vand.u32 4294901760, %v1868_v15  ;;  %v346_v33 = vand.u32 4294901760, %v1870_v16  ;;  %v349_v34 = vand.u32 4294901760, %v1884_v21  ;;  %v298_v35 = vand.u32 4294901760, %v1886_v22  ;;  %s1216_s6 = sshll.u32 %s1804_s1, 4  ;;  %s1217_s6 = int_to_ptr.vmem [resolvable:$true] %s1216_s6 }
  0x2d   :  { %70 = vperm.xlu0 %1701, %v67_v6   ;;  %v301_v36 = vand.u32 4294901760, %v1900_v27  ;;  %v2703_v37 = vmov 3   ;;  %v1913_v38 = vsub.f32 %v1854_v4, %v340_v29  ;;  %v1916_v39 = vsub.f32 %v1858_v9, %v343_v30  ;;  %v1985_v9 = vld [vmem:[#allocation5 + $0xa8] sm:$0xff]  ;;  %s1762_s7 = scalar_lea.vmem %s1217_s6, 256  ;;  %p1767_p3 = scmp.lt.s32.totalorder %s1217_s6, %s1217_s6 }
  0x2e   :  { %1703 = vset.pattern.permute.xlu1 %v2703_v37  ;;  %v1921_v40 = vsub.f32 %v1860_v10, %v292_v31  ;;  %v1926_v41 = vsub.f32 %v1868_v15, %v295_v32  ;;  %v1931_v42 = vsub.f32 %v1870_v16, %v346_v33  ;;  %v1936_v43 = vsub.f32 %v1884_v21, %v349_v34  ;;  %v2023_v15 = vld [vmem:[#allocation5 + $0x38] sm:$0xff]  ;;  %p1763_p2 = scmp.ne.s32.totalorder %s1217_s6, %s1762_s7  ;;  %p1768_p4 = scmp.lt.s32.totalorder %s1762_s7, %s1762_s7 }
  0x2f   :  { %118 = vperm.xlu1 %1703, %v115_v7   ;;  %v1941_v44 = vsub.f32 %v1886_v22, %v298_v35  ;;  %v1946_v45 = vsub.f32 %v1900_v27, %v301_v36  ;;  %v2693_v46 = vand.u32 4294901760, %v1913_v38  ;;  %v2691_v47 = vand.u32 4294901760, %v1916_v39 }
  0x30   :  { %v2689_v48 = vand.u32 4294901760, %v1921_v40  ;;  %v2688_v49 = vand.u32 4294901760, %v1926_v41  ;;  %v1798_v50 = vmov 5   ;;  %v2687_v51 = vand.u32 4294901760, %v1931_v42  ;;  %p1769_p5 = por %p1768_p4, %p1767_p3 }
  0x31   :  { %1705 = vset.pattern.permute.xlu0 %v1798_v50  ;;  %v2686_v52 = vand.u32 4294901760, %v1936_v43  ;;  %v2690_v53 = vand.u32 4294901760, %v1941_v44  ;;  %v2692_v54 = vand.u32 4294901760, %v1946_v45  ;;  %v534_v55 = vsub.f32 %v1913_v38, %v2693_v46 }
  0x32   :  { %166 = vperm.xlu0 %1705, %v163_v11   ;;  %v541_v56 = vsub.f32 %v1916_v39, %v2691_v47  ;;  %v422_v57 = vsub.f32 %v1921_v40, %v2689_v48  ;;  %v429_v58 = vsub.f32 %v1926_v41, %v2688_v49  ;;  %v2702_v59 = vmov 4   ;;  %v1987_v48 = vld [vmem:[#allocation5 + $0x20] sm:$0xff]  ;;  %p1770_p6 = pnand %p1769_p5, %p1763_p2 }
  0x33   :  { %1704 = vset.pattern.permute.xlu1 %v2702_v59  ;;  %v548_v60 = vsub.f32 %v1931_v42, %v2687_v51  ;;  %v555_v61 = vsub.f32 %v1936_v43, %v2686_v52  ;;  %v436_v62 = vsub.f32 %v1941_v44, %v2690_v53  ;;  %v443_v63 = vsub.f32 %v1946_v45, %v2692_v54  ;;  %v1989_v53 = vld [vmem:[#allocation5 + $0x28] sm:$0xff] }
  0x34   :  { %142 = vperm.xlu1 %1704, %v1856_v8   ;;  %v535_v4 = vand.u32 4294901760, %v534_v55  ;;  %v542_v5 = vand.u32 4294901760, %v541_v56  ;;  %v423_v6 = vand.u32 4294901760, %v422_v57  ;;  %v430_v7 = vand.u32 4294901760, %v429_v58  ;;  %v1995_v56 = vld [vmem:[#allocation5 + $0xb0] sm:$0xff]  ;;  %v1997_v57 = vld [vmem:[#allocation5 + $0xb8] sm:$0xff] }
  0x35   :  { %v549_v11 = vand.u32 4294901760, %v548_v60  ;;  %v556_v52 = vand.u32 4294901760, %v555_v61  ;;  %v437_v51 = vand.u32 4294901760, %v436_v62  ;;  %v444_v49 = vand.u32 4294901760, %v443_v63 }
  0x36   :  { %v1800_v47 = vmov 8   ;;  %v1525_v54 = vpack.c.bf16 %v542_v5, %v535_v4  ;;  %v1527_v46 = vpack.c.bf16 %v430_v7, %v423_v6  ;;  %v1992_v8 = vpack.c.bf16 %v343_v30, %v340_v29  ;;  %v2007_v29 = vld [vmem:[#allocation5 + $0x30] sm:$0xff] }
  0x37   :  { %1708 = vset.pattern.permute.xlu0 %v1800_v47  ;;  %v352_v55 = vand.u32 4294901760, %v1982_v2  ;;  %v1529_v58 = vpack.c.bf16 %v556_v52, %v549_v11  ;;  %v1531_v60 = vpack.c.bf16 %v444_v49, %v437_v51  ;;  %v355_v61 = vand.u32 4294901760, %v1985_v9 }
  0x38   :  { %238 = vperm.xlu0 %1708, %v1866_v14   ;;  %v2005_v62 = vpack.c.bf16 %v295_v32, %v292_v31  ;;  %v2700_v30 = vmov 6   ;;  %1526 = vmatprep.subr.bf16.mxu1 %v1525_v54  ;;  %v304_v49 = vand.u32 4294901760, %v1987_v48  ;;  %v307_v51 = vand.u32 4294901760, %v1989_v53 }
  0x39   :  { %1706 = vset.pattern.permute.xlu1 %v2700_v30  ;;  %v2013_v14 = vsub.f32 %v1982_v2, %v352_v55  ;;  %v2021_v10 = vpack.c.bf16 %v349_v34, %v346_v33  ;;  %1528 = vmatpush3.bf16.msra.mxu1 %v1527_v46  ;;  %v2027_v31 = vsub.f32 %v1985_v9, %v355_v61  ;;  %v358_v32 = vand.u32 4294901760, %v1995_v56 }
  0x3a   :  { %190 = vperm.xlu1 %1706, %v1862_v12   ;;  %v361_v52 = vand.u32 4294901760, %v1997_v57  ;;  %v2035_v16 = vpack.c.bf16 %v301_v36, %v298_v35  ;;  %1530 = vmatprep.subr.bf16.mxu1 %v1529_v58  ;;  %v2042_v12 = vsub.f32 %v1987_v48, %v304_v49  ;;  %v2047_v33 = vsub.f32 %v1989_v53, %v307_v51 }
  0x3b   :  { %1494 = vmatprep.subr.bf16.mxu0 %v1992_v8  ;;  %v2695_v21 = vand.u32 4294901760, %v2013_v14  ;;  %v310_v22 = vand.u32 4294901760, %v2007_v29  ;;  %v2694_v27 = vand.u32 4294901760, %v2027_v31  ;;  %v2056_v34 = vsub.f32 %v1995_v56, %v358_v32  ;;  %v2162_v56 = vld [vmem:[#allocation5 + $0x58] sm:$0xff] }
  0x3c   :  { %1711 = vset.pattern.permute.xlu0 %v1795_v1  ;;  %1496 = vmatpush3.bf16.msra.mxu0 %v2005_v62  ;;  %v2061_v35 = vsub.f32 %v1997_v57, %v361_v52  ;;  %v313_v36 = vand.u32 4294901760, %v2023_v15  ;;  %v2696_v46 = vand.u32 4294901760, %v2042_v12  ;;  %v2698_v54 = vand.u32 4294901760, %v2047_v33 }
  0x3d   :  { %97 = vperm.xlu0 %1711, %v1876_v18   ;;  %v562_v1 = vsub.f32 %v2013_v14, %v2695_v21  ;;  %1498 = vmatprep.subr.bf16.mxu0 %v2021_v10  ;;  %v2074_v63 = vsub.f32 %v2007_v29, %v310_v22  ;;  %v2697_v4 = vmov 7   ;;  %v569_v18 = vsub.f32 %v2027_v31, %v2694_v27 }
  0x3e   :  { %1707 = vset.pattern.permute.xlu1 %v2697_v4  ;;  %1532 = vmatpush3.bf16.msra.mxu1 %v1531_v60  ;;  %v2699_v5 = vand.u32 4294901760, %v2056_v34  ;;  %v2701_v6 = vand.u32 4294901760, %v2061_v35  ;;  %v2085_v7 = vsub.f32 %v2023_v15, %v313_v36  ;;  %v450_v11 = vsub.f32 %v2042_v12, %v2696_v46  ;;  %v2103_v46 = vld [vmem:[#allocation5 + $0xc0] sm:$0xff]  ;;  %v2105_v4 = vld [vmem:[#allocation5 + $0xc8] sm:$0xff] }
  0x3f   :  { %214 = vperm.xlu1 %1707, %v1864_v13   ;;  %v563_v9 = vand.u32 4294901760, %v562_v1  ;;  %v457_v58 = vsub.f32 %v2047_v33, %v2698_v54  ;;  %v2705_v60 = vand.u32 4294901760, %v2074_v63  ;;  %v570_v27 = vand.u32 4294901760, %v569_v18 }
  0x40   :  { %v576_v21 = vsub.f32 %v2056_v34, %v2699_v5  ;;  %v583_v13 = vsub.f32 %v2061_v35, %v2701_v6  ;;  %1500 = vmatpush3.bf16.msra.mxu0 %v2035_v16  ;;  %v2710_v1 = vand.u32 4294901760, %v2085_v7  ;;  %v451_v54 = vand.u32 4294901760, %v450_v11  ;;  %v2115_v6 = vld [vmem:[#allocation5 + $0x40] sm:$0xff]  ;;  %v2121_v11 = vld [vmem:[#allocation5 + $0x48] sm:$0xff] }
  0x41   :  { %1714 = vset.pattern.permute.xlu0 %v1798_v50  ;;  %v458_v18 = vand.u32 4294901760, %v457_v58  ;;  %v464_v5 = vsub.f32 %v2074_v63, %v2705_v60  ;;  %v2113_v30 = vpack.c.bf16 %v355_v61, %v352_v55  ;;  %v1533_v59 = vpack.c.bf16 %v570_v27, %v563_v9  ;;  %v2129_v61 = vld [vmem:[#allocation5 + $0xd8] sm:$0xff] }
  0x42   :  { %169 = vperm.xlu0 %1714, %v1889_v23   ;;  %v577_v37 = vand.u32 4294901760, %v576_v21  ;;  %v584_v28 = vand.u32 4294901760, %v583_v13  ;;  %v471_v50 = vsub.f32 %v2085_v7, %v2710_v1  ;;  %v364_v2 = vand.u32 4294901760, %v2103_v46  ;;  %v2127_v23 = vld [vmem:[#allocation5 + $0xd0] sm:$0xff] }
  0x43   :  { %1709 = vset.pattern.permute.xlu1 %v1794_v0  ;;  %v1535_v58 = vpack.c.bf16 %v458_v18, %v451_v54  ;;  %v465_v60 = vand.u32 4294901760, %v464_v5  ;;  %1502 = vmatprep.subr.bf16.mxu0 %v2113_v30  ;;  %v367_v55 = vand.u32 4294901760, %v2105_v4  ;;  %v2136_v0 = vpack.c.bf16 %v307_v51, %v304_v49 }
  0x44   :  { %49 = vperm.xlu1 %1709, %v1852_v3   ;;  %1534 = vmatprep.subr.bf16.mxu1 %v1533_v59  ;;  %v1537_v21 = vpack.c.bf16 %v584_v28, %v577_v37  ;;  %v472_v27 = vand.u32 4294901760, %v471_v50  ;;  %v2716_v54 = vand.u32 4294901760, %v2115_v6  ;;  %v2140_v5 = vsub.f32 %v2103_v46, %v364_v2  ;;  %v2152_v37 = vld [vmem:[#allocation5 + $0x50] sm:$0xff] }
  0x45   :  { %1536 = vmatpush3.bf16.msra.mxu1 %v1535_v58  ;;  %v2143_v9 = vsub.f32 %v2105_v4, %v367_v55  ;;  %v319_v3 = vand.u32 4294901760, %v2121_v11  ;;  %v2150_v28 = vpack.c.bf16 %v361_v52, %v358_v32  ;;  %v2715_v59 = vand.u32 4294901760, %v2127_v23  ;;  %1504 = vmatpush3.bf16.msra.mxu0 %v2136_v0 }
  0x46   :  { %1717 = vset.pattern.permute.xlu0 %v1800_v47  ;;  %1538 = vmatprep.subr.bf16.mxu1 %v1537_v21  ;;  %v1539_v48 = vpack.c.bf16 %v472_v27, %v465_v60  ;;  %v2158_v53 = vsub.f32 %v2115_v6, %v2716_v54  ;;  %v2713_v49 = vand.u32 4294901760, %v2129_v61  ;;  %v2709_v57 = vand.u32 4294901760, %v2140_v5  ;;  %v2239_v54 = vld [vmem:[#allocation5 + $0x68] sm:$0xff] }
  0x47   :  { %2741 = vst [vmem:[#allocation11_spill] sm:$0xff] %v2150_v28  ;;  %241 = vperm.xlu0 %1717, %v1898_v26   ;;  %v2707_v51 = vand.u32 4294901760, %v2143_v9  ;;  %v2169_v47 = vsub.f32 %v2121_v11, %v319_v3  ;;  %v2175_v32 = vpack.c.bf16 %v313_v36, %v310_v22  ;;  %v2743_v52 = vmov 1   ;;  %1506 = vmatprep.subr.bf16.mxu0 %v2150_v28 }
  0x48   :  { %1710 = vset.pattern.permute.xlu1 %v2743_v52  ;;  %v2706_v46 = vand.u32 4294901760, %v2158_v53  ;;  %v2183_v26 = vsub.f32 %v2127_v23, %v2715_v59  ;;  %v2188_v4 = vsub.f32 %v2129_v61, %v2713_v49  ;;  %v2711_v29 = vand.u32 4294901760, %v2152_v37 }
  0x49   :  { %2742 = vst [vmem:[#allocation12_spill] sm:$0xff] %v2175_v32  ;;  %73 = vperm.xlu1 %1710, %v1873_v17   ;;  %1540 = vmatpush3.bf16.msra.mxu1 %v1539_v48  ;;  %v590_v15 = vsub.f32 %v2140_v5, %v2709_v57  ;;  %v597_v22 = vsub.f32 %v2143_v9, %v2707_v51  ;;  %v2708_v36 = vand.u32 4294901760, %v2169_v47  ;;  %v325_v60 = vand.u32 4294901760, %v2162_v56  ;;  %v2217_v48 = vld [vmem:[#allocation5 + $0xe0] sm:$0xff]  ;;  %v2226_v51 = vld [vmem:[#allocation5 + $0xe8] sm:$0xff] }
  0x4a   :  { %v478_v13 = vsub.f32 %v2158_v53, %v2706_v46  ;;  %v2712_v18 = vand.u32 4294901760, %v2183_v26  ;;  %v2714_v17 = vand.u32 4294901760, %v2188_v4  ;;  %v2208_v50 = vsub.f32 %v2152_v37, %v2711_v29  ;;  %1508 = vmatpush3.bf16.msra.mxu0 %v2175_v32 }
  0x4b   :  { %v591_v11 = vand.u32 4294901760, %v590_v15  ;;  %v598_v58 = vand.u32 4294901760, %v597_v22  ;;  %v485_v21 = vsub.f32 %v2169_v47, %v2708_v36  ;;  %v2215_v27 = vsub.f32 %v2162_v56, %v325_v60 }
  0x4c   :  { %v479_v52 = vand.u32 4294901760, %v478_v13  ;;  %v604_v46 = vsub.f32 %v2183_v26, %v2712_v18  ;;  %v611_v15 = vsub.f32 %v2188_v4, %v2714_v17  ;;  %v2717_v22 = vand.u32 4294901760, %v2208_v50  ;;  %v2232_v13 = vld [vmem:[#allocation5 + $0x60] sm:$0xff] }
  0x4d   :  { %v2744_v36 = vmov 3   ;;  %v1541_v57 = vpack.c.bf16 %v598_v58, %v591_v11  ;;  %v486_v56 = vand.u32 4294901760, %v485_v21  ;;  %v2718_v1 = vand.u32 4294901760, %v2215_v27  ;;  %v289_v11 = vld [vmem:[#allocation5 + $0xf0] sm:$0xff]  ;;  %v290_v58 = vld [vmem:[#allocation5 + $0xf8] sm:$0xff] }
  0x4e   :  { %1712 = vset.pattern.permute.xlu1 %v2744_v36  ;;  %v2230_v29 = vpack.c.bf16 %v367_v55, %v364_v2  ;;  %v605_v18 = vand.u32 4294901760, %v604_v46  ;;  %v612_v49 = vand.u32 4294901760, %v611_v15  ;;  %v492_v17 = vsub.f32 %v2208_v50, %v2717_v22 }
  0x4f   :  { %121 = vperm.xlu1 %1712, %v1879_v19   ;;  %v376_v59 = vand.u32 4294901760, %v2217_v48  ;;  %1542 = vmatprep.subr.bf16.mxu1 %v1541_v57  ;;  %v1543_v36 = vpack.c.bf16 %v486_v56, %v479_v52  ;;  %v499_v2 = vsub.f32 %v2215_v27, %v2718_v1  ;;  %v379_v19 = vand.u32 4294901760, %v2226_v51  ;;  %v274_v1 = vld [vmem:[#allocation5 + $0x78] sm:$0xff] }
  0x50   :  { %2745 = vst [vmem:[#allocation13_spill] sm:$0xff] %v2230_v29  ;;  %1510 = vmatprep.subr.bf16.mxu0 %v2230_v29  ;;  %v2746_v55 = vand.u32 4294901760, %v2115_v6  ;;  %v1545_v21 = vpack.c.bf16 %v612_v49, %v605_v18  ;;  %v493_v15 = vand.u32 4294901760, %v492_v17  ;;  %v328_v57 = vand.u32 4294901760, %v2232_v13 }
  0x51   :  { %v2251_v22 = vsub.f32 %v2217_v48, %v376_v59  ;;  %1544 = vmatpush3.bf16.msra.mxu1 %v1543_v36  ;;  %v500_v52 = vand.u32 4294901760, %v499_v2  ;;  %v2255_v56 = vsub.f32 %v2226_v51, %v379_v19  ;;  %v331_v6 = vand.u32 4294901760, %v2239_v54  ;;  %v273_v2 = vld [vmem:[#allocation5 + $0x70] sm:$0xff] }
  0x52   :  { %v2248_v46 = vpack.c.bf16 %v319_v3, %v2746_v55  ;;  %v2748_v3 = vand.u32 4294901760, %v2127_v23  ;;  %v2749_v55 = vand.u32 4294901760, %v2129_v61  ;;  %v2751_v18 = vmov 4   ;;  %1546 = vmatprep.subr.bf16.mxu1 %v1545_v21 }
  0x53   :  { %1713 = vset.pattern.permute.xlu1 %v2751_v18  ;;  %v2721_v17 = vand.u32 4294901760, %v2251_v22  ;;  %v2268_v48 = vsub.f32 %v2232_v13, %v328_v57  ;;  %v382_v51 = vand.u32 4294901760, %v289_v11  ;;  %v385_v36 = vand.u32 4294901760, %v290_v58 }
  0x54   :  { %2747 = vst [vmem:[#allocation14_spill] sm:$0xff] %v2248_v46  ;;  %1512 = vmatpush3.bf16.msra.mxu0 %v2248_v46  ;;  %v2263_v49 = vpack.c.bf16 %v2749_v55, %v2748_v3  ;;  %145 = vperm.xlu1 %1713, %v1882_v20   ;;  %v1547_v46 = vpack.c.bf16 %v500_v52, %v493_v15  ;;  %v2722_v23 = vand.u32 4294901760, %v2255_v56  ;;  %v2752_v21 = vand.u32 4294901760, %v2152_v37 }
  0x55   :  { %v2273_v61 = vsub.f32 %v2239_v54, %v331_v6  ;;  %v618_v13 = vsub.f32 %v2251_v22, %v2721_v17  ;;  %v2727_v55 = vand.u32 4294901760, %v2268_v48  ;;  %v2284_v18 = vsub.f32 %v289_v11, %v382_v51 }
  0x56   :  { %2750 = vst [vmem:[#allocation15_spill] sm:$0xff] %v2263_v49  ;;  %1514 = vmatprep.subr.bf16.mxu0 %v2263_v49  ;;  %v2278_v3 = vpack.c.bf16 %v325_v60, %v2752_v21  ;;  %v2286_v20 = vsub.f32 %v290_v58, %v385_v36  ;;  %1548 = vmatpush3.bf16.msra.mxu1 %v1547_v46  ;;  %v334_v37 = vand.u32 4294901760, %v273_v2  ;;  %v337_v60 = vand.u32 4294901760, %v274_v1 }
  0x57   :  { %v625_v54 = vsub.f32 %v2255_v56, %v2722_v23  ;;  %v2732_v15 = vand.u32 4294901760, %v2273_v61  ;;  %v619_v52 = vand.u32 4294901760, %v618_v13  ;;  %v506_v21 = vsub.f32 %v2268_v48, %v2727_v55 }
  0x58   :  { %2753 = vst [vmem:[#allocation16_spill] sm:$0xff] %v2278_v3  ;;  %1516 = vmatpush3.bf16.msra.mxu0 %v2278_v3  ;;  %v2735_v11 = vand.u32 4294901760, %v2284_v18  ;;  %v2736_v58 = vand.u32 4294901760, %v2286_v20  ;;  %v2754_v46 = vmov 6   ;;  %v2302_v49 = vsub.f32 %v273_v2, %v334_v37 }
  0x59   :  { %1715 = vset.pattern.permute.xlu1 %v2754_v46  ;;  %v626_v17 = vand.u32 4294901760, %v625_v54  ;;  %v513_v23 = vsub.f32 %v2273_v61, %v2732_v15  ;;  %v2304_v3 = vsub.f32 %v274_v1, %v337_v60  ;;  %v507_v13 = vand.u32 4294901760, %v506_v21 }
  0x5a   :  { %193 = vperm.xlu1 %1715, %v1892_v24   ;;  %v632_v55 = vsub.f32 %v2284_v18, %v2735_v11  ;;  %v639_v46 = vsub.f32 %v2286_v20, %v2736_v58  ;;  %v2313_v54 = vpack.c.bf16 %v379_v19, %v376_v59  ;;  %v519_v2 = vand.u32 4294901760, %v2302_v49 }
  0x5b   :  { %v1549_v29 = vpack.c.bf16 %v626_v17, %v619_v52  ;;  %v514_v32 = vand.u32 4294901760, %v513_v23  ;;  %v526_v1 = vand.u32 4294901760, %v2304_v3  ;;  %v2318_v24 = vpack.c.bf16 %v331_v6, %v328_v57 }
  0x5c   :  { %v633_v15 = vand.u32 4294901760, %v632_v55  ;;  %v640_v28 = vand.u32 4294901760, %v639_v46  ;;  %1518 = vmatprep.subr.bf16.mxu0 %v2313_v54  ;;  %v2320_v21 = vpack.c.bf16 %v385_v36, %v382_v51  ;;  %v520_v58 = vsub.f32 %v2302_v49, %v519_v2 }
  0x5d   :  { %1550 = vmatprep.subr.bf16.mxu1 %v1549_v29  ;;  %v1551_v11 = vpack.c.bf16 %v514_v32, %v507_v13  ;;  %v527_v59 = vsub.f32 %v2304_v3, %v526_v1  ;;  %v2324_v19 = vpack.c.bf16 %v337_v60, %v334_v37  ;;  %v2755_v17 = vmov 7   ;;  %1520 = vmatpush3.bf16.msra.mxu0 %v2318_v24 }
  0x5e   :  { %1716 = vset.pattern.permute.xlu1 %v2755_v17  ;;  %v1553_v23 = vpack.c.bf16 %v640_v28, %v633_v15  ;;  %v1557_v55 = vpack.c.bf16 %v1916_v39, %v1913_v38  ;;  %v521_v32 = vand.u32 4294901760, %v520_v58  ;;  %1522 = vmatprep.subr.bf16.mxu0 %v2320_v21  ;;  %v2760_v46 = vand.u32 4294901760, %v1931_v42 }
  0x5f   :  { %217 = vperm.xlu1 %1716, %v1895_v25   ;;  %1552 = vmatpush3.bf16.msra.mxu1 %v1551_v11  ;;  %v528_v29 = vand.u32 4294901760, %v527_v59  ;;  %v2761_v58 = vand.u32 4294901760, %v1936_v43  ;;  %v2762_v17 = vand.u32 4294901760, %v2013_v14 }
  0x60   :  { %1554 = vmatprep.subr.bf16.mxu1 %v1553_v23  ;;  %v2756_v23 = vand.u32 4294901760, %v1913_v38  ;;  %v2763_v38 = vand.u32 4294901760, %v2027_v31 }
  0x61   :  { %v1555_v15 = vpack.c.bf16 %v528_v29, %v521_v32  ;;  %1524 = vmatpush3.bf16.msra.mxu0 %v2324_v19  ;;  %v2758_v29 = vand.u32 4294901760, %v1921_v40  ;;  %v2380_v59 = vpack.c.bf16 %v2761_v58, %v2760_v46  ;;  %v2771_v58 = vand.u32 4294901760, %v2074_v63 }
  0x62   :  { %1558 = vmatprep.subr.bf16.mxu0 %v1557_v55  ;;  %v2757_v55 = vand.u32 4294901760, %v1916_v39  ;;  %v2386_v11 = vpack.c.bf16 %v2763_v38, %v2762_v17  ;;  %v2765_v39 = vand.u32 4294901760, %v2042_v12  ;;  %v2772_v46 = vand.u32 4294901760, %v2085_v7 }
  0x63   :  { %1556 = vmatpush3.bf16.msra.mxu1 %v1555_v15  ;;  %v2759_v15 = vand.u32 4294901760, %v1926_v41  ;;  %v2774_v17 = vand.u32 4294901760, %v2140_v5  ;;  %v2775_v38 = vand.u32 4294901760, %v2143_v9 }
  0x64   :  { %1590 = vmatprep.subr.bf16.mxu1 %v1992_v8  ;;  %v2368_v32 = vpack.c.bf16 %v2757_v55, %v2756_v23  ;;  %2764 = vst [vmem:[#allocation17_spill] sm:$0xff] %v2386_v11  ;;  %v2766_v23 = vand.u32 4294901760, %v2047_v33  ;;  %v2404_v60 = vpack.c.bf16 %v2772_v46, %v2771_v58  ;;  %v2783_v58 = vand.u32 4294901760, %v2208_v50 }
  0x65   :  { %v2374_v13 = vpack.c.bf16 %v2759_v15, %v2758_v29  ;;  %v2768_v29 = vand.u32 4294901760, %v2056_v34  ;;  %v2769_v15 = vand.u32 4294901760, %v2061_v35  ;;  %v2410_v37 = vpack.c.bf16 %v2775_v38, %v2774_v17 }
  0x66   :  { %v2392_v55 = vpack.c.bf16 %v2766_v23, %v2765_v39  ;;  %2773 = vst [vmem:[#allocation20_spill] sm:$0xff] %v2404_v60  ;;  %v2777_v39 = vand.u32 4294901760, %v2158_v53  ;;  %v2778_v23 = vand.u32 4294901760, %v2169_v47  ;;  %v2784_v46 = vand.u32 4294901760, %v2215_v27 }
  0x67   :  { %v2398_v52 = vpack.c.bf16 %v2769_v15, %v2768_v29  ;;  %2776 = vst [vmem:[#allocation21_spill] sm:$0xff] %v2410_v37  ;;  %v2780_v29 = vand.u32 4294901760, %v2183_v26  ;;  %v2781_v15 = vand.u32 4294901760, %v2188_v4  ;;  %v2786_v17 = vand.u32 4294901760, %v2251_v22 }
  0x68   :  { %2767 = vst [vmem:[#allocation18_spill] sm:$0xff] %v2392_v55  ;;  %v2416_v25 = vpack.c.bf16 %v2778_v23, %v2777_v39  ;;  %v2428_v28 = vpack.c.bf16 %v2784_v46, %v2783_v58  ;;  %v2787_v38 = vand.u32 4294901760, %v2255_v56  ;;  %v2789_v39 = vand.u32 4294901760, %v2268_v48 }
  0x69   :  { %2770 = vst [vmem:[#allocation19_spill] sm:$0xff] %v2398_v52  ;;  %v2422_v36 = vpack.c.bf16 %v2781_v15, %v2780_v29  ;;  %v2790_v23 = vand.u32 4294901760, %v2273_v61  ;;  %v2792_v29 = vand.u32 4294901760, %v2284_v18  ;;  %v2793_v15 = vand.u32 4294901760, %v2286_v20 }
  0x6a   :  { %2779 = vst [vmem:[#allocation22_spill] sm:$0xff] %v2416_v25  ;;  %2785 = vst [vmem:[#allocation24_spill] sm:$0xff] %v2428_v28  ;;  %v2434_v51 = vpack.c.bf16 %v2787_v38, %v2786_v17  ;;  %v2448_v58 = vpack.c.bf16 %v526_v1, %v519_v2  ;;  %v42_v46 = vlaneseq  ;;  %v2797_v11 = vpack.c.bf16 %v1926_v41, %v1921_v40 }
  0x6b   :  { %2782 = vst [vmem:[#allocation23_spill] sm:$0xff] %v2422_v36  ;;  %v2440_v6 = vpack.c.bf16 %v2790_v23, %v2789_v39  ;;  %v2446_v57 = vpack.c.bf16 %v2793_v15, %v2792_v29  ;;  %v1803_v23 = vmov 0.0  }
  0x6c   :  { %2788 = vst [vmem:[#allocation25_spill] sm:$0xff] %v2434_v51  ;;  %2795 = vst [vmem:[#allocation28_spill] sm:$0xff] %v2448_v58  ;;  %v2450_v28 = vand.u32 127, %v42_v46 }
  0x6d   :  { %2791 = vst [vmem:[#allocation26_spill] sm:$0xff] %v2440_v6  ;;  %2794 = vst [vmem:[#allocation27_spill] sm:$0xff] %v2446_v57 }
  0x6e   :  { %v2453_v17 = vadd.s32 128, %v2450_v28 }
  0xa7   :  { %v47_v38 = vpop.permute.xlu0 %46 }
  0xa8   :  { %vm51_vm0 = vcmp.eq.s32.totalorder %v47_v38, %v2450_v28  ;;  %vm52_vm1 = vcmp.eq.s32.totalorder %v47_v38, %v2453_v17  ;;  %v95_v39 = vpop.permute.xlu1 %94 }
  0xa9   :  { %v1229_v6 = vsel %vm51_vm0, 1.0, %v1803_v23  ;;  %v1230_v29 = vsel %vm52_vm1, 1.0, %v1803_v23  ;;  %vm99_vm2 = vcmp.eq.s32.totalorder %v95_v39, %v2450_v28  ;;  %vm100_vm3 = vcmp.eq.s32.totalorder %v95_v39, %v2453_v17 }
  0xaa   :  { %v1237_v57 = vsel %vm99_vm2, 1.0, %v1803_v23  ;;  %v1238_v51 = vsel %vm100_vm3, 1.0, %v1803_v23 }
  0xac   :  { %v71_v15 = vpop.permute.xlu0 %70 }
  0xad   :  { %vm75_vm4 = vcmp.eq.s32.totalorder %v71_v15, %v2450_v28  ;;  %vm76_vm5 = vcmp.eq.s32.totalorder %v71_v15, %v2453_v17 }
  0xae   :  { %v1233_v2 = vsel %vm75_vm4, 1.0, %v1803_v23  ;;  %v1234_v1 = vsel %vm76_vm5, 1.0, %v1803_v23  ;;  %v119_v46 = vpop.permute.xlu1 %118 }
  0xaf   :  { %v87_v38 = vadd.f32 %v1233_v2, %v1229_v6  ;;  %v88_v58 = vadd.f32 %v1234_v1, %v1230_v29  ;;  %vm123_vm6 = vcmp.eq.s32.totalorder %v119_v46, %v2450_v28  ;;  %vm124_vm7 = vcmp.eq.s32.totalorder %v119_v46, %v2453_v17 }
  0xb0   :  { %v1241_v15 = vsel %vm123_vm6, 1.0, %v1803_v23  ;;  %v1242_v37 = vsel %vm124_vm7, 1.0, %v1803_v23 }
  0xb1   :  { %v111_v39 = vadd.f32 %v1237_v57, %v87_v38  ;;  %v112_v36 = vadd.f32 %v1238_v51, %v88_v58  ;;  %v167_v25 = vpop.permute.xlu0 %166 }
  0xb2   :  { %vm171_vm10 = vcmp.eq.s32.totalorder %v167_v25, %v2450_v28  ;;  %vm172_vm11 = vcmp.eq.s32.totalorder %v167_v25, %v2453_v17 }
  0xb3   :  { %v135_v60 = vadd.f32 %v1241_v15, %v111_v39  ;;  %v136_v52 = vadd.f32 %v1242_v37, %v112_v36  ;;  %v143_v55 = vpop.permute.xlu1 %142  ;;  %v1249_v29 = vsel %vm171_vm10, 1.0, %v1803_v23  ;;  %v1250_v2 = vsel %vm172_vm11, 1.0, %v1803_v23 }
  0xb4   :  { %vm147_vm8 = vcmp.eq.s32.totalorder %v143_v55, %v2450_v28  ;;  %vm148_vm9 = vcmp.eq.s32.totalorder %v143_v55, %v2453_v17 }
  0xb5   :  { %v1245_v6 = vsel %vm147_vm8, 1.0, %v1803_v23  ;;  %v1246_v57 = vsel %vm148_vm9, 1.0, %v1803_v23 }
  0xb6   :  { %v159_v51 = vadd.f32 %v1245_v6, %v135_v60  ;;  %v160_v58 = vadd.f32 %v1246_v57, %v136_v52 }
  0xb7   :  { %v239_v37 = vpop.permute.xlu0 %238 }
  0xb8   :  { %v183_v55 = vadd.f32 %v1249_v29, %v159_v51  ;;  %v184_v1 = vadd.f32 %v1250_v2, %v160_v58  ;;  %vm243_vm14 = vcmp.eq.s32.totalorder %v239_v37, %v2450_v28  ;;  %vm244_vm15 = vcmp.eq.s32.totalorder %v239_v37, %v2453_v17 }
  0xb9   :  { %v191_v36 = vpop.permute.xlu1 %190  ;;  %v1261_v6 = vsel %vm243_vm14, 1.0, %v1803_v23  ;;  %v1262_v57 = vsel %vm244_vm15, 1.0, %v1803_v23 }
  0xba   :  { %vm195_vm12 = vcmp.eq.s32.totalorder %v191_v36, %v2450_v28  ;;  %vm196_vm13 = vcmp.eq.s32.totalorder %v191_v36, %v2453_v17 }
  0xbb   :  { %v1253_v25 = vsel %vm195_vm12, 1.0, %v1803_v23  ;;  %v1254_v46 = vsel %vm196_vm13, 1.0, %v1803_v23 }
  0xbc   :  { %v207_v52 = vadd.f32 %v1253_v25, %v183_v55  ;;  %v208_v38 = vadd.f32 %v1254_v46, %v184_v1  ;;  %v98_v1 = vpop.permute.xlu0 %97 }
  0xbd   :  { %vm101_vm4 = vcmp.eq.s32.totalorder %v98_v1, %v2450_v28  ;;  %vm102_vm5 = vcmp.eq.s32.totalorder %v98_v1, %v2453_v17 }
  0xbe   :  { %v215_v60 = vpop.permute.xlu1 %214 }
  0xbf   :  { %vm219_vm0 = vcmp.eq.s32.totalorder %v215_v60, %v2450_v28  ;;  %vm220_vm1 = vcmp.eq.s32.totalorder %v215_v60, %v2453_v17 }
  0xc0   :  { %v1257_v39 = vsel %vm219_vm0, 1.0, %v1803_v23  ;;  %v1258_v15 = vsel %vm220_vm1, 1.0, %v1803_v23 }
  0xc1   :  { %v231_v51 = vadd.f32 %v1257_v39, %v207_v52  ;;  %v232_v58 = vadd.f32 %v1258_v15, %v208_v38 }
  0xc3   :  { %v255_v29 = vadd.f32 %v1261_v6, %v231_v51  ;;  %v256_v2 = vadd.f32 %v1262_v57, %v232_v58  ;;  %v50_v36 = vpop.permute.xlu1 %49 }
  0xc4   :  { %vm53_vm2 = vcmp.eq.s32.totalorder %v50_v36, %v2450_v28  ;;  %vm54_vm3 = vcmp.eq.s32.totalorder %v50_v36, %v2453_v17  ;;  %v1239_v36 = vsel %vm101_vm4, 1.0, %v1803_v23 }
  0xc5   :  { %v2491_v37 = vand.u32 4294901760, %v256_v2  ;;  %v2493_v55 = vand.u32 4294901760, %v255_v29  ;;  %v1231_v39 = vsel %vm53_vm2, 1.0, %v1803_v23  ;;  %v1232_v15 = vsel %vm54_vm3, 1.0, %v1803_v23 }
  0xc7   :  { %2796 = vst [vmem:[#allocation29_spill] sm:$0xff] %v2493_v55  ;;  %v2496_v25 = vsub.f32 %v255_v29, %v2493_v55  ;;  %643 = vmatprep.mubr.f32.mxu1 %v2491_v37  ;;  %v2502_v46 = vsub.f32 %v256_v2, %v2491_v37 }
  0xc8   :  { %v74_v60 = vpop.permute.xlu1 %73  ;;  %645 = vmatmul.mubr.f32.vlgmr.msra.gmra.mrb[0].mxu1 %v2493_v55 }
  0xc9   :  { %vm77_vm6 = vcmp.eq.s32.totalorder %v74_v60, %v2450_v28  ;;  %vm78_vm7 = vcmp.eq.s32.totalorder %v74_v60, %v2453_v17  ;;  %1592 = vmatpush3.bf16.msra.mxu1 %v2005_v62  ;;  %v2740_v52 = vand.u32 4294901760, %v2502_v46  ;;  %v2739_v38 = vand.u32 4294901760, %v2496_v25 }
  0xca   :  { %v1235_v6 = vsel %vm77_vm6, 1.0, %v1803_v23  ;;  %v1236_v57 = vsel %vm78_vm7, 1.0, %v1803_v23  ;;  %1594 = vmatprep.subr.bf16.mxu1 %v2021_v10  ;;  %v1240_v60 = vsel %vm102_vm5, 1.0, %v1803_v23 }
  0xcb   :  { %v89_v51 = vadd.f32 %v1235_v6, %v1231_v39  ;;  %v90_v58 = vadd.f32 %v1236_v57, %v1232_v15  ;;  %v390_v29 = vsub.f32 %v2502_v46, %v2740_v52  ;;  %v396_v2 = vsub.f32 %v2496_v25, %v2739_v38  ;;  %v170_v38 = vpop.permute.xlu0 %169 }
  0xcc   :  { %vm173_vm10 = vcmp.eq.s32.totalorder %v170_v38, %v2450_v28  ;;  %vm174_vm11 = vcmp.eq.s32.totalorder %v170_v38, %v2453_v17 }
  0xcd   :  { %1596 = vmatpush3.bf16.msra.mxu1 %v2035_v16  ;;  %v391_v39 = vand.u32 4294901760, %v390_v29  ;;  %v397_v15 = vand.u32 4294901760, %v396_v2  ;;  %v113_v6 = vadd.f32 %v1239_v36, %v89_v51  ;;  %v114_v57 = vadd.f32 %v1240_v60, %v90_v58  ;;  %v2799_v51 = vld [vmem:[#allocation11_spill] sm:$0xff] }
  0xce   :  { %v122_v55 = vpop.permute.xlu1 %121  ;;  %1598 = vmatprep.subr.bf16.mxu1 %v2113_v30  ;;  %v1251_v38 = vsel %vm173_vm10, 1.0, %v1803_v23  ;;  %v2802_v60 = vpack.c.bf16 %v2027_v31, %v2013_v14  ;;  %v2806_v31 = vpack.c.bf16 %v2061_v35, %v2056_v34 }
  0xcf   :  { %vm125_vm8 = vcmp.eq.s32.totalorder %v122_v55, %v2450_v28  ;;  %vm126_vm9 = vcmp.eq.s32.totalorder %v122_v55, %v2453_v17  ;;  %392 = vmatprep.mubr.f32.mxu0 %v391_v39  ;;  %v2798_v55 = vpack.c.bf16 %v1936_v43, %v1931_v42  ;;  %v2800_v42 = vpack.c.bf16 %v1946_v45, %v1941_v44  ;;  %v2801_v43 = vld [vmem:[#allocation12_spill] sm:$0xff]  ;;  %v2803_v39 = vld [vmem:[#allocation13_spill] sm:$0xff] }
  0xd0   :  { %v1243_v52 = vsel %vm125_vm8, 1.0, %v1803_v23  ;;  %v1244_v1 = vsel %vm126_vm9, 1.0, %v1803_v23  ;;  %398 = vmatmul.mubr.f32.vlgmr.msra.gmra.mrb[0].mxu0 %v397_v15 }
  0xd1   :  { %1560 = vmatpush3.bf16.msra.mxu0 %v2797_v11  ;;  %1600 = vmatpush3.bf16.msra.mxu1 %v2136_v0  ;;  %v137_v58 = vadd.f32 %v1243_v52, %v113_v6  ;;  %v138_v2 = vadd.f32 %v1244_v1, %v114_v57  ;;  %v1252_v52 = vsel %vm174_vm11, 1.0, %v1803_v23  ;;  %v242_v57 = vpop.permute.xlu0 %241 }
  0xd2   :  { %1562 = vmatprep.subr.bf16.mxu0 %v2798_v55  ;;  %1602 = vmatprep.subr.bf16.mxu1 %v2799_v51  ;;  %v2804_v55 = vpack.c.bf16 %v2047_v33, %v2042_v12  ;;  %vm245_vm0 = vcmp.eq.s32.totalorder %v242_v57, %v2450_v28  ;;  %vm246_vm1 = vcmp.eq.s32.totalorder %v242_v57, %v2453_v17  ;;  %v2809_v33 = vld [vmem:[#allocation16_spill] sm:$0xff] }
  0xd3   :  { %v146_v29 = vpop.permute.xlu1 %145  ;;  %v2808_v12 = vpack.c.bf16 %v2085_v7, %v2074_v63  ;;  %v2816_v57 = vpack.c.bf16 %v2273_v61, %v2268_v48  ;;  %v2827_v48 = vld [vmem:[#allocation22_spill] sm:$0xff]  ;;  %v2828_v61 = vld [vmem:[#allocation23_spill] sm:$0xff] }
  0xd4   :  { %vm149_vm12 = vcmp.eq.s32.totalorder %v146_v29, %v2450_v28  ;;  %vm150_vm13 = vcmp.eq.s32.totalorder %v146_v29, %v2453_v17 }
  0xd5   :  { %v1247_v40 = vsel %vm149_vm12, 1.0, %v1803_v23  ;;  %v1248_v41 = vsel %vm150_vm13, 1.0, %v1803_v23  ;;  %1564 = vmatpush3.bf16.msra.mxu0 %v2800_v42  ;;  %1604 = vmatpush3.bf16.msra.mxu1 %v2801_v43  ;;  %v2810_v42 = vpack.c.bf16 %v2143_v9, %v2140_v5 }
  0xd6   :  { %v161_v11 = vadd.f32 %v1247_v40, %v137_v58  ;;  %v162_v36 = vadd.f32 %v1248_v41, %v138_v2  ;;  %1566 = vmatprep.subr.bf16.mxu0 %v2802_v60  ;;  %1606 = vmatprep.subr.bf16.mxu1 %v2803_v39  ;;  %v2805_v58 = vld [vmem:[#allocation14_spill] sm:$0xff]  ;;  %v2807_v2 = vld [vmem:[#allocation15_spill] sm:$0xff]  ;;  %v2812_v60 = vpack.c.bf16 %v2188_v4, %v2183_v26  ;;  %v2815_v26 = vand.u32 4294901760, %v2502_v46 }
  0xd8   :  { %v185_v6 = vadd.f32 %v1251_v38, %v161_v11  ;;  %v186_v1 = vadd.f32 %v1252_v52, %v162_v36  ;;  %v1263_v36 = vsel %vm245_vm0, 1.0, %v1803_v23  ;;  %v1264_v38 = vsel %vm246_vm1, 1.0, %v1803_v23 }
  0xd9   :  { %v194_v15 = vpop.permute.xlu1 %193  ;;  %1568 = vmatpush3.bf16.msra.mxu0 %v2804_v55  ;;  %1608 = vmatpush3.bf16.msra.mxu1 %v2805_v58  ;;  %v2811_v52 = vpack.c.bf16 %v2169_v47, %v2158_v53  ;;  %v2813_v53 = vpack.c.bf16 %v2215_v27, %v2208_v50  ;;  %v2814_v47 = vpack.c.bf16 %v2255_v56, %v2251_v22 }
  0xda   :  { %vm197_vm14 = vcmp.eq.s32.totalorder %v194_v15, %v2450_v28  ;;  %vm198_vm15 = vcmp.eq.s32.totalorder %v194_v15, %v2453_v17  ;;  %1570 = vmatprep.subr.bf16.mxu0 %v2806_v31  ;;  %1610 = vmatprep.subr.bf16.mxu1 %v2807_v2  ;;  %v2818_v22 = vpack.c.bf16 %v2286_v20, %v2284_v18  ;;  %v2830_v18 = vld [vmem:[#allocation25_spill] sm:$0xff] }
  0xdb   :  { %v1255_v29 = vsel %vm197_vm14, 1.0, %v1803_v23  ;;  %v1256_v14 = vsel %vm198_vm15, 1.0, %v1803_v23  ;;  %v2831_v20 = vld [vmem:[#allocation29_spill] sm:$0xff] }
  0xdc   :  { %v209_v40 = vadd.f32 %v1255_v29, %v185_v6  ;;  %v210_v11 = vadd.f32 %v1256_v14, %v186_v1  ;;  %v2817_v1 = vand.u32 4294901760, %v2496_v25 }
  0xdd   :  { %1572 = vmatpush3.bf16.msra.mxu0 %v2808_v12  ;;  %1612 = vmatpush3.bf16.msra.mxu1 %v2809_v33 }
  0xde   :  { %v218_v41 = vpop.permute.xlu1 %217  ;;  %1574 = vmatprep.subr.bf16.mxu0 %v2810_v42  ;;  %1614 = vmatprep.subr.bf16.mxu1 %v2313_v54 }
  0xdf   :  { %vm221_vm2 = vcmp.eq.s32.totalorder %v218_v41, %v2450_v28  ;;  %vm222_vm3 = vcmp.eq.s32.totalorder %v218_v41, %v2453_v17 }
  0xe0   :  { %v1259_v34 = vsel %vm221_vm2, 1.0, %v1803_v23  ;;  %v1260_v35 = vsel %vm222_vm3, 1.0, %v1803_v23 }
  0xe1   :  { %v233_v28 = vadd.f32 %v1259_v34, %v209_v40  ;;  %v234_v17 = vadd.f32 %v1260_v35, %v210_v11  ;;  %1576 = vmatpush3.bf16.msra.mxu0 %v2811_v52  ;;  %1616 = vmatpush3.bf16.msra.mxu1 %v2318_v24 }
  0xe2   :  { %1578 = vmatprep.subr.bf16.mxu0 %v2812_v60  ;;  %1618 = vmatprep.subr.bf16.mxu1 %v2320_v21 }
  0xe3   :  { %v257_v63 = vadd.f32 %v1263_v36, %v233_v28  ;;  %v258_v7 = vadd.f32 %v1264_v38, %v234_v17 }
  0xe5   :  { %v2595_v5 = vand.u32 4294901760, %v258_v7  ;;  %v2597_v9 = vand.u32 4294901760, %v257_v63  ;;  %1580 = vmatpush3.bf16.msra.mxu0 %v2813_v53  ;;  %1620 = vmatpush3.bf16.msra.mxu1 %v2324_v19 }
  0xe6   :  { %1582 = vmatprep.subr.bf16.mxu0 %v2814_v47  ;;  %1654 = vmatprep.subr.bf16.mxu1 %v1992_v8  ;;  %v2819_v8 = vpack.c.bf16 %v2304_v3, %v2302_v49  ;;  %v2829_v3 = vld [vmem:[#allocation24_spill] sm:$0xff] }
  0xe7   :  { %v403_v23 = vsub.f32 %v258_v7, %v2595_v5  ;;  %v409_v15 = vsub.f32 %v257_v63, %v2597_v9  ;;  %650 = vmatprep.mubr.f32.mxu1 %v2595_v5 }
  0xe8   :  { %652 = vmatmul.mubr.f32.gmra.mrb[2].mxu1 %v2597_v9 }
  0xe9   :  { %903 = vmatprep.mubr.f32.mxu1 %v2815_v26  ;;  %v404_v4 = vand.u32 4294901760, %v403_v23  ;;  %v410_v6 = vand.u32 4294901760, %v409_v15  ;;  %1584 = vmatpush3.bf16.msra.mxu0 %v2816_v57 }
  0xea   :  { %1586 = vmatprep.subr.bf16.mxu0 %v2818_v22 }
  0xeb   :  { %v405_v50 = vsub.f32 %v403_v23, %v404_v4  ;;  %v411_v27 = vsub.f32 %v409_v15, %v410_v6 }
  0xec   :  { %907 = vmatmul.mubr.f32.vlgmr.msra.gmra.mrb[4].mxu1 %v2817_v1 }
  0xed   :  { %1656 = vmatpush3.bf16.msra.mxu1 %v2005_v62  ;;  %914 = vmatprep.mubr.f32.mxu1 %v404_v4  ;;  %v406_v56 = vand.u32 4294901760, %v405_v50  ;;  %v412_v29 = vand.u32 4294901760, %v411_v27  ;;  %v2820_v62 = vand.u32 4294901760, %v1941_v44  ;;  %v2824_v44 = vld [vmem:[#allocation19_spill] sm:$0xff] }
  0xee   :  { %1658 = vmatprep.subr.bf16.mxu1 %v2021_v10  ;;  %1588 = vmatpush3.bf16.msra.mxu0 %v2819_v8  ;;  %v2821_v10 = vand.u32 4294901760, %v1946_v45  ;;  %v2825_v45 = vld [vmem:[#allocation20_spill] sm:$0xff] }
  0xef   :  { %407 = vmatprep.mubr.f32.mxu0 %v406_v56  ;;  %1622 = vmatprep.subr.bf16.mxu0 %v2368_v32 }
  0xf0   :  { %413 = vmatmul.mubr.f32.gmra.mrb[2].mxu0 %v412_v29  ;;  %918 = vmatmul.mubr.f32.gmra.mrb[6].mxu1 %v410_v6  ;;  %v1627_v49 = vpack.c.bf16 %v2821_v10, %v2820_v62 }
  0xf1   :  { %1660 = vmatpush3.bf16.msra.mxu1 %v2035_v16  ;;  %787 = vmatprep.mubr.f32.mxu0 %v2502_v46  ;;  %v2823_v16 = vld [vmem:[#allocation18_spill] sm:$0xff] }
  0xf2   :  { %1195 = vmatprep.mubr.f32.mxu1 %v2491_v37  ;;  %1662 = vmatprep.subr.bf16.mxu1 %v2113_v30  ;;  %v2822_v30 = vld [vmem:[#allocation17_spill] sm:$0xff] }
  0xf4   :  { %790 = vmatmul.mubr.f32.vlgmr.msra.gmra.mrb[4].mxu0 %v2496_v25 }
  0xf5   :  { %1624 = vmatpush3.bf16.msra.mxu0 %v2374_v13  ;;  %1664 = vmatpush3.bf16.msra.mxu1 %v2136_v0  ;;  %v2826_v0 = vld [vmem:[#allocation21_spill] sm:$0xff]  ;;  %v2832_v13 = vld [vmem:[#allocation26_spill] sm:$0xff] }
  0xf6   :  { %796 = vmatprep.mubr.f32.mxu0 %v403_v23  ;;  %1626 = vmatprep.subr.bf16.mxu0 %v2380_v59 }
  0xf7   :  { %1666 = vmatprep.subr.bf16.mxu1 %v2799_v51 }
  0xf8   :  { %799 = vmatmul.mubr.f32.gmra.mrb[6].mxu0 %v409_v15 }
  0xf9   :  { %1628 = vmatpush3.bf16.msra.mxu0 %v1627_v49  ;;  %1668 = vmatpush3.bf16.msra.mxu1 %v2801_v43 }
  0xfa   :  { %1084 = vmatprep.mubr.f32.mxu0 %v2491_v37  ;;  %1630 = vmatprep.subr.bf16.mxu0 %v2822_v30 }
  0xfb   :  { %1670 = vmatprep.subr.bf16.mxu1 %v2803_v39 }
  0xfd   :  { %1632 = vmatpush3.bf16.msra.mxu0 %v2823_v16  ;;  %1672 = vmatpush3.bf16.msra.mxu1 %v2805_v58 }
  0xfe   :  { %1634 = vmatprep.subr.bf16.mxu0 %v2824_v44  ;;  %1674 = vmatprep.subr.bf16.mxu1 %v2807_v2 }
 0x101   :  { %1636 = vmatpush3.bf16.msra.mxu0 %v2825_v45  ;;  %1676 = vmatpush3.bf16.msra.mxu1 %v2809_v33 }
 0x102   :  { %1638 = vmatprep.subr.bf16.mxu0 %v2826_v0  ;;  %1678 = vmatprep.subr.bf16.mxu1 %v2313_v54  ;;  %v2833_v54 = vld [vmem:[#allocation27_spill] sm:$0xff] }
 0x105   :  { %1640 = vmatpush3.bf16.msra.mxu0 %v2827_v48  ;;  %1680 = vmatpush3.bf16.msra.mxu1 %v2318_v24  ;;  %v2834_v24 = vld [vmem:[#allocation28_spill] sm:$0xff] }
 0x106   :  { %1642 = vmatprep.subr.bf16.mxu0 %v2828_v61  ;;  %1682 = vmatprep.subr.bf16.mxu1 %v2320_v21 }
 0x109   :  { %1644 = vmatpush3.bf16.msra.mxu0 %v2829_v3  ;;  %1684 = vmatpush3.bf16.msra.mxu1 %v2324_v19 }
 0x10a   :  { %1646 = vmatprep.subr.bf16.mxu0 %v2830_v18 }
 0x10c   :  { %1197 = vmatmul.mubr.f32.vlgmr.msra.gmra.mrb[8].mxu1 %v2831_v20 }
 0x10d   :  { %1648 = vmatpush3.bf16.msra.mxu0 %v2832_v13  ;;  %1202 = vmatprep.mubr.f32.mxu1 %v2595_v5 }
 0x10e   :  { %1650 = vmatprep.subr.bf16.mxu0 %v2833_v54 }
 0x110   :  { %1204 = vmatmul.mubr.f32.gmra.mrb[10].mxu1 %v2597_v9 }
 0x111   :  { %1652 = vmatpush3.bf16.msra.mxu0 %v2834_v24 }
 0x114   :  { %1086 = vmatmul.mubr.f32.vlgmr.msra.gmra.mrb[8].mxu0 %v2831_v20 }
 0x115   :  { %1091 = vmatprep.mubr.f32.mxu0 %v2595_v5 }
 0x118   :  { %1093 = vmatmul.mubr.f32.gmra.mrb[10].mxu0 %v2597_v9 }
 0x19b   :  { %v1335_v21 = vpop.f32.mrb[0].mxu1 }
 0x19c   :  { %v1336_v19 = vpop.f32.mrb[1].mxu1 }
 0x19d   :  { %v1337_v59 = vadd.f32 %v1336_v19, %v1335_v21 }
 0x1a3   :  { %v1297_v32 = vpop.f32.mrb[0].mxu0 }
 0x1a4   :  { %v1298_v37 = vpop.f32.mrb[1].mxu0 }
 0x1a5   :  { %v1299_v25 = vadd.f32 %v1298_v37, %v1297_v32 }
 0x1a7   :  { %v647_v46 = vadd.f32 %v1337_v59, %v1299_v25 }
 0x1bb   :  { %v1338_v51 = vpop.f32.mrb[2].mxu1 }
 0x1bc   :  { %v1339_v43 = vpop.f32.mrb[3].mxu1 }
 0x1bd   :  { %v1340_v39 = vadd.f32 %v1339_v43, %v1338_v51 }
 0x1bf   :  { %v1411_v55 = vpop.f32.mrb[4].mxu1 }
 0x1c0   :  { %v1412_v58 = vpop.f32.mrb[5].mxu1 }
 0x1c1   :  { %v1413_v14 = vadd.f32 %v1412_v58, %v1411_v55 }
 0x1c3   :  { %v1300_v31 = vpop.f32.mrb[2].mxu0  ;;  %v1414_v2 = vpop.f32.mrb[6].mxu1 }
 0x1c4   :  { %v1301_v40 = vpop.f32.mrb[3].mxu0  ;;  %v1415_v41 = vpop.f32.mrb[7].mxu1 }
 0x1c5   :  { %v1302_v11 = vadd.f32 %v1301_v40, %v1300_v31  ;;  %v1416_v12 = vadd.f32 %v1415_v41, %v1414_v2 }
 0x1c7   :  { %v654_v33 = vadd.f32 %v1340_v39, %v1302_v11  ;;  %v1373_v34 = vpop.f32.mrb[4].mxu0 }
 0x1c8   :  { %v1374_v35 = vpop.f32.mrb[5].mxu0 }
 0x1c9   :  { %v1375_v36 = vadd.f32 %v1374_v35, %v1373_v34 }
 0x1cb   :  { %v792_v38 = vadd.f32 %v1375_v36, %v647_v46  ;;  %v1376_v42 = vpop.f32.mrb[6].mxu0 }
 0x1cc   :  { %v1377_v28 = vpop.f32.mrb[7].mxu0 }
 0x1cd   :  { %v1378_v17 = vadd.f32 %v1377_v28, %v1376_v42  ;;  %v909_v63 = vadd.f32 %v1413_v14, %v792_v38 }
 0x1cf   :  { %v801_v7 = vadd.f32 %v1378_v17, %v654_v33 }
 0x1d1   :  { %v920_v52 = vadd.f32 %v1416_v12, %v801_v7 }
 0x1df   :  { %v1487_v60 = vpop.f32.mrb[8].mxu1 }
 0x1e0   :  { %v1488_v5 = vpop.f32.mrb[9].mxu1 }
 0x1e1   :  { %v1489_v9 = vadd.f32 %v1488_v5, %v1487_v60 }
 0x1e3   :  { %v1490_v23 = vpop.f32.mrb[10].mxu1 }
 0x1e4   :  { %v1491_v15 = vpop.f32.mrb[11].mxu1 }
 0x1e5   :  { %v1492_v53 = vadd.f32 %v1491_v15, %v1490_v23 }
 0x1e7   :  { %v1449_v47 = vpop.f32.mrb[8].mxu0 }
 0x1e8   :  { %v1450_v26 = vpop.f32.mrb[9].mxu0 }
 0x1e9   :  { %v1451_v4 = vadd.f32 %v1450_v26, %v1449_v47 }
 0x1eb   :  { %v1088_v6 = vadd.f32 %v1451_v4, %v909_v63  ;;  %v1452_v57 = vpop.f32.mrb[10].mxu0 }
 0x1ec   :  { %v1453_v50 = vpop.f32.mrb[11].mxu0 }
 0x1ed   :  { %v1199_v27 = vadd.f32 %v1489_v9, %v1088_v6  ;;  %v1454_v1 = vadd.f32 %v1453_v50, %v1452_v57 }
 0x1ef   :  { %1209 = vst [vmem:[#allocation7] sm:$0xff] %v1199_v27  ;;  %v1095_v22 = vadd.f32 %v1454_v1, %v920_v52 }
 0x1f1   :  { %v1206_v56 = vadd.f32 %v1492_v53, %v1095_v22 }
 0x1f3   :  { %1210 = vst [vmem:[#allocation7 + $0x8] sm:$0xff] %v1206_v56 }
 0x1f4   :  { %1773 = shalt.err (!%p1770_p6)
}
 0x1f5   :  { %s1774_s10 = scalar_lea.hbm %s2685_s2, 256 }
 0x1f6   :  { %p1775_p7 = scmp.ne.s32.totalorder %s2685_s2, %s1774_s10  ;;  %p1778_p8 = scmp.lt.u32.totalorder %s1774_s10, %s2685_s2 }
 0x1f8   :  { %p1780_p9 = pnand %p1778_p8, %p1775_p7 }
 0x1fa   :  { %1783 = shalt.err (!%p1780_p9)
}
 0x1fb   :  { %1222 = dma.vmem_to_hbm [thread:$0]  %s1217_s6, 256, %s2685_s2, [#allocation4], %s1791_s19, %s1791_s19, %s1792_s20  }
 0x1fc   :  { %1788 = dma.done.wait [#allocation4], 256  }
 0x1fd   :  { %1789 = vsyncadd [#allocation4], 4294967040 }
 0x1fe   :  { %1226 = vsyncpa [#allocation3], 1 }
 0x1ff   :  { %1227 = vsyncpa [#allocation6], 1 }
 0x200   :  { %1228 = vsyncpa [#allocation4], 1 }

</bundles_post_ra>
